<compile_context>
chip_gen: v7x
topology: tpu7x:2x2x1
jax: 0.10.0
libtpu: 0.0.40
codegen_flags: <defaults>
</compile_context>

<pallas_src>
import jax
import jax.numpy as jnp
from jax import lax
from jax.experimental import pallas as pl
from jax.experimental.pallas import tpu as pltpu

_EPS = 1e-5


# ---------------------------------------------------------------------------
# Tiling policy helpers
# ---------------------------------------------------------------------------
def _vmem_budget():
    """Return (vmem_limit_bytes, working_set_budget_bytes), chip-aware."""
    limit = 48 * 1024 * 1024  # safe default (v7x has 64 MiB physical per TC)
    try:
        cap = int(pltpu.get_tpu_info().vmem_capacity_bytes)
        # 128 MiB parts (v5e/v6e) -> 64 MiB scoped limit; 64 MiB (v7x) -> 48 MiB.
        limit = max(32 * 1024 * 1024, min(64 * 1024 * 1024, (cap * 3) // 4))
    except Exception:
        pass
    budget = limit - 8 * 1024 * 1024  # headroom for Mosaic internal scratch
    return limit, budget


def _choose_row_split(n, itemsize):
    """Factor n = r * c with r filling the sublane axis and ideally c % 128 == 0."""
    candidates = (16, 8, 32, 4, 2) if itemsize < 4 else (8, 16, 32, 4, 2)
    # Preferred: lane-dense columns (unmasked vector stores on the output).
    for r in candidates:
        if n % r == 0 and (n // r) % 128 == 0:
            return r
    # Still fill sublanes even if the lane dim is ragged (block dims equal to
    # the full array dims are always legal); never collapse to r=1 here.
    for r in candidates:
        if n % r == 0:
            return r
    return 1  # n has no small factor (e.g. prime): whole row on the lane axis.


def _choose_batch_tile(b, n, itemsize, budget):
    """Largest batch tile whose pipelined working set fits the VMEM budget,
    capped so the grid keeps >= 4 steps (megacore + DMA pipelining)."""
    # Per batch row: double-buffered in + out blocks (2*2*itemsize B/elem)
    # plus one live f32 temporary for the fused-moment pass (4 B/elem).
    per_row = n * (4 * itemsize + 4)
    tb = max(1, budget // per_row)
    tb = min(tb, 1024)                    # diminishing returns beyond this
    tb = min(tb, max(1, pl.cdiv(b, 4)))   # keep >= 4 grid steps when b >= 4
    return max(1, min(int(tb), b))


def _largest_divisor_at_most(c, target, step):
    cand = (min(target, c) // step) * step
    while cand >= step:
        if c % cand == 0:
            return cand
        cand -= step
    return None


def _pick_chunk_cols(c, target):
    target = max(int(target), 1)
    if target >= c:
        return c
    cc = _largest_divisor_at_most(c, target, 128)  # lane-dense chunk if possible
    if cc is None:
        cc = _largest_divisor_at_most(c, target, 1)
    return cc if cc is not None else c


# ---------------------------------------------------------------------------
# Kernels
# ---------------------------------------------------------------------------
def _ln_fused_kernel(x_ref, o_ref):
    """Whole (R, C) sample per grid step; fused first/second moments."""
    # For sub-32-bit dtypes the widening fuses per-vreg into the consumers
    # (bf16 VPU paths on v6e/v7x); reductions/normalization run in f32.
    xf = x_ref[...].astype(jnp.float32)
    r, c = xf.shape[1], xf.shape[2]
    inv_n = 1.0 / float(r * c)
    # One traversal: lane reduction then sublane reduction for both moments.
    s = jnp.sum(jnp.sum(xf, axis=2, keepdims=True), axis=1, keepdims=True)
    q = jnp.sum(jnp.sum(xf * xf, axis=2, keepdims=True), axis=1, keepdims=True)
    mean = s * inv_n
    # E[x^2] - mean^2 in f32 is fine for layer norm; clamp guards cancellation.
    var = jnp.maximum(q * inv_n - mean * mean, 0.0)
    inv = lax.rsqrt(var + _EPS)
    o_ref[...] = ((xf - mean) * inv).astype(o_ref.dtype)


def _chunked_path(x3, b, r, c, n, itemsize, vmem_limit, budget, chunk_cols=None):
    """Large-N path: per-sample row does not fit a single block.  Chunk the
    lane axis, accumulate partial moments in VMEM scratch (pl.when
    init/finalize), then normalize in a second streaming pass."""
    bytes_per_elem = 4 * itemsize + 4
    tb = min(b, 8, max(1, pl.cdiv(b, 4)))
    if chunk_cols is None:
        chunk_cols = max(128, budget // max(1, tb * r * bytes_per_elem))
    cc = _pick_chunk_cols(c, chunk_cols)
    nb = pl.cdiv(b, tb)
    nc = c // cc
    inv_n = 1.0 / float(n)

    def stats_kernel(x_ref, mean_ref, inv_ref, s_acc, q_acc):
        j = pl.program_id(1)

        @pl.when(j == 0)
        def _():
            s_acc[...] = jnp.zeros_like(s_acc)
            q_acc[...] = jnp.zeros_like(q_acc)

        xf = x_ref[...].astype(jnp.float32)
        s_acc[...] += jnp.sum(jnp.sum(xf, axis=2, keepdims=True),
                              axis=1, keepdims=True)
        q_acc[...] += jnp.sum(jnp.sum(xf * xf, axis=2, keepdims=True),
                              axis=1, keepdims=True)

        @pl.when(j == pl.num_programs(1) - 1)
        def _():
            mean = s_acc[...] * inv_n
            var = jnp.maximum(q_acc[...] * inv_n - mean * mean, 0.0)
            inv = lax.rsqrt(var + _EPS)
            mean_ref[...] = jnp.broadcast_to(mean, mean_ref.shape)
            inv_ref[...] = jnp.broadcast_to(inv, inv_ref.shape)

    mean, inv = pl.pallas_call(
        stats_kernel,
        out_shape=(jax.ShapeDtypeStruct((b, 1, 128), jnp.float32),
                   jax.ShapeDtypeStruct((b, 1, 128), jnp.float32)),
        grid=(nb, nc),
        in_specs=[pl.BlockSpec((tb, r, cc), lambda i, j: (i, 0, j))],
        out_specs=(pl.BlockSpec((tb, 1, 128), lambda i, j: (i, 0, 0)),
                   pl.BlockSpec((tb, 1, 128), lambda i, j: (i, 0, 0))),
        scratch_shapes=[pltpu.VMEM((tb, 1, 1), jnp.float32),
                        pltpu.VMEM((tb, 1, 1), jnp.float32)],
        compiler_params=pltpu.CompilerParams(
            dimension_semantics=("parallel", "arbitrary"),
            vmem_limit_bytes=vmem_limit,
        ),
        cost_estimate=pl.CostEstimate(
            flops=3 * b * n, transcendentals=b,
            bytes_accessed=b * n * itemsize,
        ),
    )(x3)

    def apply_kernel(x_ref, mean_ref, inv_ref, o_ref):
        xf = x_ref[...].astype(jnp.float32)
        mu = mean_ref[...][:, :, 0:1]   # (tb, 1, 1) broadcast over (r, cc)
        iv = inv_ref[...][:, :, 0:1]
        o_ref[...] = ((xf - mu) * iv).astype(o_ref.dtype)

    return pl.pallas_call(
        apply_kernel,
        out_shape=jax.ShapeDtypeStruct((b, r, c), x3.dtype),
        grid=(nb, nc),
        in_specs=[pl.BlockSpec((tb, r, cc), lambda i, j: (i, 0, j)),
                  pl.BlockSpec((tb, 1, 128), lambda i, j: (i, 0, 0)),
                  pl.BlockSpec((tb, 1, 128), lambda i, j: (i, 0, 0))],
        out_specs=pl.BlockSpec((tb, r, cc), lambda i, j: (i, 0, j)),
        compiler_params=pltpu.CompilerParams(
            dimension_semantics=("parallel", "parallel"),
            vmem_limit_bytes=vmem_limit,
        ),
        cost_estimate=pl.CostEstimate(
            flops=2 * b * n, transcendentals=0,
            bytes_accessed=2 * b * n * itemsize,
        ),
    )(x3, mean, inv)


# ---------------------------------------------------------------------------
# Public wrapper
# ---------------------------------------------------------------------------
def frozen_layer_norm(x, *, _force_chunked=False, _chunk_cols=None):
    """Pallas implementation of FrozenLayerNorm.forward:
    F.layer_norm(x, x.shape[1:]) — mean/var over all non-batch dims,
    eps=1e-5, no learnable affine."""
    orig_shape = x.shape
    b = int(orig_shape[0])
    n = 1
    for d in orig_shape[1:]:
        n *= int(d)

    itemsize = jnp.dtype(x.dtype).itemsize
    r = _choose_row_split(n, itemsize)
    c = n // r
    x3 = x.reshape(b, r, c)

    vmem_limit, budget = _vmem_budget()
    per_row = n * (4 * itemsize + 4)

    if _force_chunked or per_row > budget:
        out3 = _chunked_path(x3, b, r, c, n, itemsize, vmem_limit, budget,
                             chunk_cols=_chunk_cols)
    else:
        tb = _choose_batch_tile(b, n, itemsize, budget)
        out3 = pl.pallas_call(
            _ln_fused_kernel,
            out_shape=jax.ShapeDtypeStruct((b, r, c), x.dtype),
            grid=(pl.cdiv(b, tb),),
            in_specs=[pl.BlockSpec((tb, r, c), lambda i: (i, 0, 0))],
            out_specs=pl.BlockSpec((tb, r, c), lambda i: (i, 0, 0)),
            compiler_params=pltpu.CompilerParams(
                dimension_semantics=("parallel",),
                vmem_limit_bytes=vmem_limit,
            ),
            cost_estimate=pl.CostEstimate(
                flops=7 * b * n, transcendentals=b,
                bytes_accessed=2 * b * n * itemsize,
            ),
        )(x3)

    return out3.reshape(orig_shape)


def _reference(x):
    # Pure-JAX reference mirroring F.layer_norm(x, x.shape[1:]).
    b = x.shape[0]
    xf = x.reshape(b, -1).astype(jnp.float32)
    mean = jnp.mean(xf, axis=-1, keepdims=True)
    var = jnp.mean((xf - mean) ** 2, axis=-1, keepdims=True)
    y = (xf - mean) * lax.rsqrt(var + _EPS)
    return y.reshape(x.shape).astype(x.dtype)


if __name__ == "__main__":
    key = jax.random.PRNGKey(0)
    k1, k2 = jax.random.split(key)

    # NCHW-style conv-embedding input: B=2, C=4, H=W=16 (N = 1024 per sample).
    x = jax.random.normal(k1, (2, 4, 16, 16), dtype=jnp.float32) * 2.0 + 0.5
    out = jax.block_until_ready(frozen_layer_norm(x))
    ref = _reference(x)
    assert out.shape == x.shape and out.dtype == x.dtype
    assert jnp.allclose(out, ref, atol=2e-5, rtol=2e-5), "fused-path mismatch"

    # Exercise the large-N chunked path at a small size (forced).
    x2 = jax.random.normal(k2, (4, 8, 8, 32), dtype=jnp.float32) - 1.5
    out2 = jax.block_until_ready(
        frozen_layer_norm(x2, _force_chunked=True, _chunk_cols=128))
    ref2 = _reference(x2)
    assert out2.shape == x2.shape and out2.dtype == x2.dtype
    assert jnp.allclose(out2, ref2, atol=2e-5, rtol=2e-5), "chunked-path mismatch"

    print("KERNEL_OK")
</pallas_src>

<mosaic_0001>
module attributes {stable_mosaic.version = 11 : i64} {
  func.func @_ln_fused_kernel(%arg0: i32, %arg1: memref<1x8x128xf32, #tpu.memory_space<vmem>>, %arg2: memref<1x8x128xf32, #tpu.memory_space<vmem>>) attributes {dimension_semantics = [#tpu.dimension_semantics<parallel>], iteration_bounds = array<i64: 2>, scalar_prefetch = 0 : i64, scratch_operands = 0 : i64, tpu.core_type = #tpu.core_type<tc>, window_params = [{transform_indices = @transform_0, window_bounds = array<i64: 1, 8, 128>}, {transform_indices = @transform_1, window_bounds = array<i64: 1, 8, 128>}]} {
    %c0 = arith.constant 0 : index
    %c0_0 = arith.constant 0 : index
    %c0_1 = arith.constant 0 : index
    %0 = vector.load %arg1[%c0, %c0_0, %c0_1] : memref<1x8x128xf32, #tpu.memory_space<vmem>>, vector<1x8x128xf32>
    %cst = arith.constant dense<0.000000e+00> : vector<1x8xf32>
    %1 = vector.multi_reduction <add>, %0, %cst [2] : vector<1x8x128xf32> to vector<1x8xf32>
    %2 = vector.shape_cast %1 : vector<1x8xf32> to vector<1x8x1xf32>
    %cst_2 = arith.constant dense<0.000000e+00> : vector<1x1xf32>
    %3 = vector.multi_reduction <add>, %2, %cst_2 [1] : vector<1x8x1xf32> to vector<1x1xf32>
    %4 = vector.shape_cast %3 : vector<1x1xf32> to vector<1x1x1xf32>
    %5 = arith.mulf %0, %0 : vector<1x8x128xf32>
    %cst_3 = arith.constant dense<0.000000e+00> : vector<1x8xf32>
    %6 = vector.multi_reduction <add>, %5, %cst_3 [2] : vector<1x8x128xf32> to vector<1x8xf32>
    %7 = vector.shape_cast %6 : vector<1x8xf32> to vector<1x8x1xf32>
    %cst_4 = arith.constant dense<0.000000e+00> : vector<1x1xf32>
    %8 = vector.multi_reduction <add>, %7, %cst_4 [1] : vector<1x8x1xf32> to vector<1x1xf32>
    %9 = vector.shape_cast %8 : vector<1x1xf32> to vector<1x1x1xf32>
    %cst_5 = arith.constant 9.765625E-4 : f32
    %10 = vector.broadcast %cst_5 : f32 to vector<1x1x1xf32>
    %11 = arith.mulf %4, %10 : vector<1x1x1xf32>
    %cst_6 = arith.constant 9.765625E-4 : f32
    %12 = vector.broadcast %cst_6 : f32 to vector<1x1x1xf32>
    %13 = arith.mulf %9, %12 : vector<1x1x1xf32>
    %14 = arith.mulf %11, %11 : vector<1x1x1xf32>
    %15 = arith.subf %13, %14 : vector<1x1x1xf32>
    %cst_7 = arith.constant 0.000000e+00 : f32
    %16 = vector.broadcast %cst_7 : f32 to vector<1x1x1xf32>
    %17 = arith.maximumf %15, %16 : vector<1x1x1xf32>
    %cst_8 = arith.constant 9.99999974E-6 : f32
    %18 = vector.broadcast %cst_8 : f32 to vector<1x1x1xf32>
    %19 = arith.addf %17, %18 : vector<1x1x1xf32>
    %20 = math.rsqrt %19 : vector<1x1x1xf32>
    %21 = vector.broadcast %11 : vector<1x1x1xf32> to vector<1x8x128xf32>
    %22 = arith.subf %0, %21 : vector<1x8x128xf32>
    %23 = vector.broadcast %20 : vector<1x1x1xf32> to vector<1x8x128xf32>
    %24 = arith.mulf %22, %23 : vector<1x8x128xf32>
    %c0_9 = arith.constant 0 : index
    %c0_10 = arith.constant 0 : index
    %c0_11 = arith.constant 0 : index
    %25 = vector.load %arg2[%c0_9, %c0_10, %c0_11] : memref<1x8x128xf32, #tpu.memory_space<vmem>>, vector<1x8x128xf32>
    tpu.vector_store %arg2[%c0_9, %c0_10, %c0_11], %24 {strides = array<i32>} : memref<1x8x128xf32, #tpu.memory_space<vmem>>, vector<1x8x128xf32>,
    return
  }
  func.func @transform_0(%arg0: i32) -> (i32, i32, i32) {
    %c0_i32 = arith.constant 0 : i32
    %c0_i32_0 = arith.constant 0 : i32
    %c0_i32_1 = arith.constant 0 : i32
    return %arg0, %c0_i32, %c0_i32_0 : i32, i32, i32
  }
  func.func @transform_1(%arg0: i32) -> (i32, i32, i32) {
    %c0_i32 = arith.constant 0 : i32
    %c0_i32_0 = arith.constant 0 : i32
    %c0_i32_1 = arith.constant 0 : i32
    return %arg0, %c0_i32, %c0_i32_0 : i32, i32, i32
  }
}

</mosaic_0001>

<bundles_post_ra>
// kernel: tpu_custom_call.1
= control target key start
LH: loop header
LB: loop body
LE: loop exit
PB: predicated region body
PF: predicated region fallthrough
CT: control target
= control target key end

     0   :  { %6 = vsyncpa [#allocation3], 0  ;;  %s579_s0 = inlined_call_operand.hbm [shape: f32[2,8,128], index: 0, kind: input, shape index: {}]   ;;  %s580_s1 = inlined_call_operand.hbm [shape: f32[2,8,128], index: 1, kind: output, shape index: {}]  }
   0x1   :  { %8 = vsyncpa [#allocation3 + $0x1], 0 }
   0x2   :  { %9 = vsyncpa [#allocation4], 0 }
   0x3   :  { %11 = vsyncpa [#allocation4 + $0x1], 0  ;;  %s414_s6 = smov 0   ;;  %s416_s7 = smov 0  }
   0x4   :  { %s418_s8 = smov 0   ;;  %s420_s9 = smov 0  }
   0x5 LB: > { %s435_s10 = sadd.s32 4294967295, %s400_s9   ;;  %s244_s11 = sadd.s32 4294967294, %s400_s9   ;;  %s400_s9 = sphi %s420_s9, %s595_s9   ;;  %s396_s8 = sphi %s418_s8, %s594_s8   ;;  %s392_s7 = sphi %s416_s7, %s593_s7   ;;  %s388_s6 = sphi %s414_s6, %s592_s6  }
   0x6   : > { %s439_s12 = sadd.s32 1, %s400_s9   ;;  %s24_s13 = sadd.s32 1, %s396_s8 }
   0x7   : > { %s21_s14 = ssub.s32 %s400_s9, %s439_s12  ;;  %p31_p0 = scmp.ne.s32.totalorder %s396_s8, %s392_s7 }
   0x8   : > { %p22_p1 = scmp.eq.s32.totalorder %s21_s14, 0  ;;  %p32_p2 = scmp.eq.s32.totalorder %s400_s9, 0 }
   0x9   : > { %p37_p3 = scmp.ne.s32.totalorder %s392_s7, %s388_s6  ;;  %p38_p4 = scmp.eq.s32.totalorder %s435_s10, 0 }
   0xa   : > { %s451_s15 = scalar_select %p22_p1, %s396_s8, %s24_s13  }
   0xb   : > { %p453_p5 = por %p32_p2, %p31_p0  ;;  %p457_p6 = por %p38_p4, %p37_p3 }
   0xc   : > { %p61_p7 = scmp.eq.s32.totalorder %s435_s10, 1  ;;  %p67_p8 = scmp.eq.s32.totalorder %s244_s11, 1 }
   0xd   : > { %p268_p10 = scmp.lt.s32.totalorder %s400_s9, 2  ;;  %s87_s20 = sand.u32 1, %s396_s8  }
   0xe   : > { %p464_p11 = por %p61_p7, %p31_p0  ;;  %p468_p12 = por %p67_p8, %p37_p3 }
   0xf   : > { %s248_s21 = sshll.u32 %s400_s9, 7  ;;  %s247_s22 = sshll.u32 %s87_s20, 3 }
  0x10   : > { %s584_s18 = scalar_select %p464_p11, 1, 0 }
  0x11   : > { %s585_s19 = scalar_select %p468_p12, 1, 0 }
  0x12   : > { %s477_s25 = scalar_lea.hbm %s579_s0, %s248_s21  ;;  %s91_s26 = scalar_lea.vmem [#allocation2], %s247_s22 }
  0x13   : > { %s98_s27 = sshll.u32 %s91_s26, 4  ;;  %p481_p13 = pnand %p268_p10, %p453_p5  ;;  %s485_s27 = int_to_ptr.vmem [resolvable:$true] %s98_s27 }
  0x14   : > { %s88_s29 = scalar_lea.sflag [#allocation3], %s87_s20  ;;  %s304_s30 = scalar_lea.hbm %s477_s25, 128 }
  0x15   : > { %p305_p2 = scmp.ne.s32.totalorder %s477_s25, %s304_s30  ;;  %p306_p3 = pneg %p481_p13 }
  0x16   : > { %s309_s4 = scalar_lea.hbm %s579_s0, 256  ;;  %p310_p5 = scmp.lt.u32.totalorder %s477_s25, %s579_s0 }
  0x17   : > { %p307_p4 = pnand %p306_p3, %p305_p2  ;;  %p311_p8 = scmp.lt.u32.totalorder %s309_s4, %s304_s30 }
  0x18   : > { %p313_p9 = scmp.lt.u32.totalorder %s304_s30, %s477_s25 }
  0x19   : > { %p308_p7 = pneg %p307_p4  ;;  %p312_p10 = por %p311_p8, %p310_p5 }
  0x1b   : > { %p314_p0 = por %p313_p9, %p312_p10 }
  0x1d   : > { %p315_p1 = pnand %p314_p0, %p308_p7 }
  0x1f   : > { %318 = shalt.err (!%p315_p1)
}
  0x20   : > { %s319_s13 = scalar_lea.vmem %s485_s27, 128  ;;  %s402_s14 = smov [#allocation2]  }
  0x21   : > { %p320_p2 = scmp.ne.s32.totalorder %s485_s27, %s319_s13  ;;  %s324_s16 = sshll.u32 %s402_s14, 4  ;;  %s325_s16 = int_to_ptr.vmem [resolvable:$false] %s324_s16 }
  0x22   : > { %s326_s20 = scalar_lea.vmem %s325_s16, 256  ;;  %p327_p11 = scmp.lt.s32.totalorder %s485_s27, %s325_s16 }
  0x23   : > { %p322_p4 = pnand %p320_p2, %p306_p3  ;;  %p328_p5 = scmp.lt.s32.totalorder %s326_s20, %s319_s13 }
  0x25   : > { %p323_p12 = pneg %p322_p4  ;;  %p329_p8 = por %p328_p5, %p327_p11 }
  0x27   : > { %p330_p9 = pnand %p329_p8, %p323_p12 }
  0x29   : > { %333 = shalt.err (!%p330_p9)
}
  0x2a   : > { %263 = dma.hbm_to_vmem [thread:$0]  (!%p481_p13), %s477_s25, 128, %s485_s27, %s88_s29  }
  0x2b   : > { %p587_p0 = scmp.lt.s32.totalorder %s400_s9, 3  ;;  %p588_p1 = scmp.ge.s32.totalorder %s400_s9, 1 }
  0x2d   : > { %p104_p3 = pnand %p588_p1, %p587_p0 }
  0x2e   : > { %s519_s21 = sand.u32 (!%p104_p3), 1, %s392_s7  }
  0x2f   : > { %107 = sbr.rel (%p104_p3) target bundleno = 249 (0xf9), region = 24  ;;  %s250_s22 = sshll.u32 (!%p104_p3), %s519_s21, 3 }
  0x30   : > { %s110_s23 = scalar_lea.sflag (!%p104_p3), [#allocation3], %s519_s21  ;;  %s113_s24 = scalar_lea.vmem (!%p104_p3), [#allocation2], %s250_s22 }
  0x36   : > { %379 = dma.done.wait (%p457_p6), %s110_s23, 128  }
  0x37   : > { %381 = vsyncadd (%p457_p6), %s110_s23, 4294967168  ;;  %v132_v0 = vld [vmem:[%s113_s24] sm:$0xff]  ;;  %s253_s17 = sshll.u32 %s435_s10, 7  ;;  %s131_s25 = scalar_lea.vmem [#allocation5], %s250_s22 }
  0x38   : > { %133 = vadd.xlane.f32.xlu0 %v132_v0  ;;  %v141_v1 = vmul.f32 %v132_v0, %v132_v0  ;;  %s174_s26 = sshll.u32 %s131_s25, 4  ;;  %s535_s29 = scalar_lea.hbm %s580_s1, %s253_s17  ;;  %s537_s26 = int_to_ptr.vmem [resolvable:$true] %s174_s26 }
  0x39   : > { %s161_s30 = scalar_lea.sflag [#allocation4], %s519_s21  ;;  %s334_s2 = scalar_lea.vmem %s537_s26, 128 }
  0x3a   : > { %p335_p6 = scmp.ne.s32.totalorder %s537_s26, %s334_s2  ;;  %p589_p11 = scmp.ne.s32.totalorder %s584_s18, 0 }
  0x3b   : > { %s403_s10 = smov [#allocation5]  }
  0x3c   : > { %142 = vadd.xlane.f32.xlu0 %v141_v1  ;;  %p336_p12 = pnand %p335_p6, %p589_p11  ;;  %s338_s3 = sshll.u32 %s403_s10, 4  ;;  %s339_s3 = int_to_ptr.vmem [resolvable:$false] %s338_s3 }
  0x3d   : > { %s340_s4 = scalar_lea.vmem %s339_s3, 256  ;;  %p341_p7 = scmp.lt.s32.totalorder %s537_s26, %s339_s3 }
  0x3e   : > { %p337_p13 = pneg %p336_p12  ;;  %p342_p10 = scmp.lt.s32.totalorder %s340_s4, %s334_s2 }
  0x40   : > { %p343_p2 = por %p342_p10, %p341_p7 }
  0x42   : > { %p344_p4 = pnand %p343_p2, %p337_p13 }
  0xc5   : > { %v134_v2 = vpop.xlane.xlu0 %133 }
  0xc6   : > { %v135_v3 = vrot.slane %v134_v2, 4 }
  0xc8   : > { %v136_v4 = vadd.f32 %v135_v3, %v134_v2 }
  0xc9   : > { %v143_v5 = vpop.xlane.xlu0 %142 }
  0xca   : > { %v137_v6 = vrot.slane %v136_v4, 2  ;;  %v144_v7 = vrot.slane %v143_v5, 4 }
  0xcc   : > { %v138_v8 = vadd.f32 %v137_v6, %v136_v4  ;;  %v145_v9 = vadd.f32 %v144_v7, %v143_v5 }
  0xce   : > { %v139_v10 = vrot.slane %v138_v8, 1  ;;  %v146_v11 = vrot.slane %v145_v9, 2 }
  0xd0   : > { %v140_v12 = vadd.f32 %v139_v10, %v138_v8  ;;  %v147_v13 = vadd.f32 %v146_v11, %v145_v9 }
  0xd2   : > { %v150_v14 = vmul.f32 0.0009765625, %v140_v12  ;;  %v148_v15 = vrot.slane %v147_v13, 1 }
  0xd4   : > { %v149_v16 = vadd.f32 %v148_v15, %v147_v13  ;;  %v152_v17 = vmul.f32 %v150_v14, %v150_v14  ;;  %v157_v22 = vsub.f32 %v132_v0, %v150_v14 }
  0xd6   : > { %v151_v18 = vmul.f32 0.0009765625, %v149_v16 }
  0xd8   : > { %v153_v19 = vsub.f32 %v151_v18, %v152_v17 }
  0xda   : > { %v154_v20 = vmax.f32 %v153_v19, 0.0 }
  0xdc   : > { %v155_v21 = vadd.f32 1e-05, %v154_v20 }
  0xde   : > { %302 = vrsqrt.f32 %v155_v21 }
  0xe8   : > { %v303_v23 = vpop.eup %302 }
  0xe9   : > { %v158_v24 = vmul.f32 %v303_v23, %v157_v22 }
  0xeb   : > { %159 = vst [vmem:[%s131_s25] sm:$0xff] %v158_v24 }
  0xec   : > { %347 = shalt.err (!%p344_p4)
}
  0xed   : > { %s348_s5 = scalar_lea.hbm %s535_s29, 128  ;;  %s352_s14 = scalar_lea.hbm %s580_s1, 256 }
  0xee   : > { %p349_p5 = scmp.ne.s32.totalorder %s535_s29, %s348_s5  ;;  %p353_p0 = scmp.lt.u32.totalorder %s535_s29, %s580_s1 }
  0xef   : > { %p354_p1 = scmp.lt.u32.totalorder %s352_s14, %s348_s5  ;;  %p356_p6 = scmp.lt.u32.totalorder %s348_s5, %s535_s29 }
  0xf0   : > { %p350_p8 = pnand %p349_p5, %p589_p11 }
  0xf1   : > { %p355_p3 = por %p354_p1, %p353_p0 }
  0xf2   : > { %p351_p9 = pneg %p350_p8 }
  0xf3   : > { %p357_p12 = por %p356_p6, %p355_p3 }
  0xf5   : > { %p358_p13 = pnand %p357_p12, %p351_p9 }
  0xf7   : > { %361 = shalt.err (!%p358_p13)
}
  0xf8   : > { %258 = dma.vmem_to_hbm [thread:$0]  (%p589_p11), %s537_s26, 128, %s535_s29, %s161_s30  }
  0xf9 PF: > { %s186_s21 = sand.u32 1, %s388_s6   ;;  %p590_p7 = scmp.ne.s32.totalorder %s585_s19, 0 }
  0xfa   : > { %p591_p10 = scmp.ge.s32.totalorder %s400_s9, 2  ;;  %s187_s22 = scalar_lea.sflag [#allocation4], %s186_s21 }
  0xfc   : > { %p265_p2 = pnand %p591_p10, %p590_p7 }
  0xfe   : > { %383 = dma.done.wait (!%p265_p2), %s187_s22, 128  }
  0xff   : > { %385 = vsyncadd (!%p265_p2), %s187_s22, 4294967168  ;;  %p14_p4 = scmp.ge.s32.totalorder %s439_s12, 4   ;;  %s592_s6 = smov %s392_s7 }
 0x100   : > { %s593_s7 = smov %s396_s8  ;;  %s594_s8 = smov %s451_s15 }
 0x101   : > { %s595_s9 = smov %s439_s12  ;;  %16 = sbr.rel (!%p14_p4) target bundleno = 5 (0x5), region = 69 }
 0x108   :  { %192 = vsyncpa [#allocation3], 1 }
 0x109   :  { %194 = vsyncpa [#allocation3 + $0x1], 1 }
 0x10a   :  { %195 = vsyncpa [#allocation4], 1 }
 0x10b   :  { %197 = vsyncpa [#allocation4 + $0x1], 1 }

</bundles_post_ra>
